<compile_context>
chip_gen: v6e
topology: v6e:2x2x1
jax: 0.10.0
libtpu: 0.0.40
codegen_flags: <defaults>
</compile_context>

<pallas_src>
import functools
from typing import NamedTuple

import jax
import jax.numpy as jnp
from jax.experimental import pallas as pl
from jax.experimental.pallas import tpu as pltpu


# --------------------------------------------------------------------------- #
# Small helpers
# --------------------------------------------------------------------------- #
def _round_up(x, m):
    return ((x + m - 1) // m) * m


def _sublane(dtype):
    return {4: 8, 2: 16, 1: 32}.get(jnp.dtype(dtype).itemsize, 8)


def _pick_tile(extent, candidates):
    """Largest candidate tile whose padding overhead on `extent` is <= 1/8."""
    for t in candidates:
        padded = _round_up(extent, t)
        if padded - extent <= max(extent // 8, 0):
            return t, padded
    t = candidates[-1]
    return t, _round_up(extent, t)


def _largest_divisor(extent, candidates):
    for t in candidates:
        if extent % t == 0:
            return t
    return candidates[-1]


def _vmem_budget():
    cap = 64 << 20
    try:
        info = pltpu.get_tpu_info()
        cap = int(getattr(info, "vmem_capacity_bytes", cap) or cap)
    except Exception:
        pass
    # Stay well under physical VMEM (v7x: 64 MiB, v5e/v6e: 128 MiB).
    return min(int(cap * 0.45), 96 << 20), cap


# --------------------------------------------------------------------------- #
# Kernels
# --------------------------------------------------------------------------- #
def _dora_weight_kernel(w0t_ref, a_ref, b_ref, m_ref, o_ref, *, alpha):
    """Two-pass path, pass 1: merged + normalized + magnitude-scaled weight."""
    delta = jnp.dot(a_ref[...], b_ref[...], preferred_element_type=jnp.float32)
    v = w0t_ref[...].astype(jnp.float32) + jnp.float32(alpha) * delta
    ssq = jnp.sum(v * v, axis=1, keepdims=True)                 # norm over out
    scale = jnp.where(ssq > 0.0,
                      m_ref[...].astype(jnp.float32) * jax.lax.rsqrt(ssq), 0.0)
    o_ref[...] = (v * scale).astype(o_ref.dtype)


def _dora_scale_kernel(w0t_ref, a_ref, b_ref, m_ref, s_ref, *, alpha):
    """Fused path, pass 1: only the (K, 1) per-column scale s = m / ||V||."""
    delta = jnp.dot(a_ref[...], b_ref[...], preferred_element_type=jnp.float32)
    v = w0t_ref[...].astype(jnp.float32) + jnp.float32(alpha) * delta
    ssq = jnp.sum(v * v, axis=1, keepdims=True)
    s_ref[...] = jnp.where(ssq > 0.0,
                           m_ref[...].astype(jnp.float32) * jax.lax.rsqrt(ssq),
                           0.0)


def _matmul_bias_kernel(x_ref, w_ref, b_ref, o_ref, *scratch, nsteps_k):
    """Two-pass path, pass 2: out = x @ W_scaled.T + bias."""
    part = jnp.dot(x_ref[...], w_ref[...], preferred_element_type=jnp.float32)
    if nsteps_k == 1:                       # no accumulator needed
        o_ref[...] = (part + b_ref[...].astype(jnp.float32)).astype(o_ref.dtype)
        return
    acc_ref, = scratch
    k = pl.program_id(2)

    @pl.when(k == 0)
    def _init():
        acc_ref[...] = jnp.zeros_like(acc_ref)

    acc_ref[...] += part

    @pl.when(k == pl.num_programs(2) - 1)
    def _finalize():
        o_ref[...] = (acc_ref[...]
                      + b_ref[...].astype(jnp.float32)).astype(o_ref.dtype)


def _dora_fused_matmul_kernel(x_ref, w0t_ref, a_ref, b_ref, s_ref, bias_ref,
                              o_ref, *scratch, alpha, nsteps_k, compute_dtype):
    """Fused path, pass 2: build the weight tile on the fly, then matmul."""
    delta = jnp.dot(a_ref[...], b_ref[...], preferred_element_type=jnp.float32)
    w = (w0t_ref[...].astype(jnp.float32) + jnp.float32(alpha) * delta)
    w = (w * s_ref[...].astype(jnp.float32)).astype(compute_dtype)
    part = jnp.dot(x_ref[...], w, preferred_element_type=jnp.float32)
    if nsteps_k == 1:
        o_ref[...] = (part
                      + bias_ref[...].astype(jnp.float32)).astype(o_ref.dtype)
        return
    acc_ref, = scratch
    k = pl.program_id(2)

    @pl.when(k == 0)
    def _init():
        acc_ref[...] = jnp.zeros_like(acc_ref)

    acc_ref[...] += part

    @pl.when(k == pl.num_programs(2) - 1)
    def _finalize():
        o_ref[...] = (acc_ref[...]
                      + bias_ref[...].astype(jnp.float32)).astype(o_ref.dtype)


# --------------------------------------------------------------------------- #
# One-time weight preparation (hoisted out of the per-call forward)
# --------------------------------------------------------------------------- #
class DoraWeights(NamedTuple):
    w0t: jax.Array     # (Kp, Np) compute dtype, padded W0^T
    a: jax.Array       # (Kp, rp) compute dtype, padded A
    b: jax.Array       # (rp, Np) compute dtype, padded B
    m: jax.Array       # (Kp, 1)  f32, padded magnitude
    bias: jax.Array    # (1, Np)  f32, padded bias


def prepare_dora_weights(w0, bias, A, B, m, *, compute_dtype=jnp.bfloat16):
    out_features, in_features = w0.shape
    in_a, rank = A.shape
    rank_b, out_b = B.shape
    assert in_a == in_features and rank_b == rank and out_b == out_features
    assert rank > 0, "Rank must be greater than 0"

    cdt = jnp.dtype(compute_dtype)
    sub_c = _sublane(cdt)
    # Pad only to hardware minimums, then extend (<= 1/8) so a decent tile divides.
    _, Kp = _pick_tile(_round_up(in_features, 128), (2048, 1024, 512, 256, 128))
    _, Np = _pick_tile(_round_up(out_features, 128), (512, 256, 128))
    rp = _round_up(rank, sub_c)          # sublane multiple, NOT 128

    w0t_p = jnp.zeros((Kp, Np), cdt).at[:in_features, :out_features].set(
        w0.T.astype(cdt))
    a_p = jnp.zeros((Kp, rp), cdt).at[:in_features, :rank].set(A.astype(cdt))
    b_p = jnp.zeros((rp, Np), cdt).at[:rank, :out_features].set(B.astype(cdt))
    m_p = jnp.zeros((Kp, 1), jnp.float32).at[:in_features, :].set(
        m.reshape(in_features, 1).astype(jnp.float32))
    if bias is None:
        bias_p = jnp.zeros((1, Np), jnp.float32)
    else:
        bias_p = jnp.zeros((1, Np), jnp.float32).at[0, :out_features].set(
            bias.reshape(out_features).astype(jnp.float32))
    return DoraWeights(w0t_p, a_p, b_p, m_p, bias_p)


# --------------------------------------------------------------------------- #
# Forward
# --------------------------------------------------------------------------- #
@functools.partial(jax.jit, static_argnames=("alpha", "out_features", "fuse"))
def dora_forward(x, weights, *, alpha, out_features, fuse=None):
    """x: (..., in) -> (..., out) using pre-padded DoraWeights."""
    w0t_p, a_p, b_p, m_p, bias_p = weights
    Kp, Np = w0t_p.shape
    rp = a_p.shape[1]
    cdt = w0t_p.dtype
    c_isz = jnp.dtype(cdt).itemsize
    out_dtype = x.dtype
    o_isz = jnp.dtype(out_dtype).itemsize
    in_features = x.shape[-1]
    assert in_features <= Kp and out_features <= Np

    lead = x.shape[:-1]
    M = 1
    for d in lead:
        M *= d
    x2d = x.reshape(M, in_features)

    budget, cap = _vmem_budget()

    # ----- tiling: tiles divide padded extents, hardware-minimum padding only
    m_align = max(_sublane(cdt), _sublane(out_dtype))
    tm_cands = tuple(t for t in (512, 256, 128, 64, 32, 16) if t % m_align == 0)
    tm, Mp = _pick_tile(_round_up(M, m_align), tm_cands)
    tn_cands = (1024, 512, 256, 128) if budget >= (48 << 20) else (512, 256, 128)
    tk = _largest_divisor(Kp, (2048, 1024, 512, 256, 128))
    tn = _largest_divisor(Np, tn_cands)

    if fuse is None:                      # decode / small-batch regime
        fuse = (Mp // tm) <= 2

    def _mm_need(tm_, tn_, tk_):
        need = (2 * tm_ * tk_ * c_isz          # x blocks
                + 2 * tn_ * 4                  # bias blocks
                + 2 * tm_ * tn_ * o_isz        # output blocks
                + tm_ * tn_ * 4)               # f32 accumulator
        if fuse:
            need += (2 * tk_ * tn_ * c_isz     # W0^T blocks
                     + 2 * tk_ * rp * c_isz    # A blocks
                     + 2 * rp * tn_ * c_isz    # B blocks
                     + 2 * tk_ * 4)            # scale blocks
        else:
            need += 2 * tk_ * tn_ * c_isz      # merged-weight blocks
        return need

    while _mm_need(tm, tn, tk) > budget:
        if tk > 128:
            tk //= 2
        elif tn > 128:
            tn //= 2
        elif tm > m_align:
            tm //= 2
        else:
            break

    nsteps_k = Kp // tk
    grid = (Mp // tm, Np // tn, nsteps_k)

    # ----- pad x only when needed (weights were padded once at prep time)
    if (M, in_features) == (Mp, Kp) and x2d.dtype == cdt:
        x_p = x2d
    else:
        x_p = jnp.zeros((Mp, Kp), cdt).at[:M, :in_features].set(x2d.astype(cdt))

    # ----- pass-1 tiling (rows of K, full out width per tile for the row norm)
    sub_c = _sublane(cdt)
    ti_cands = tuple(t for t in (512, 256, 128, 64, 32, 16) if t % sub_c == 0)
    ti = _largest_divisor(Kp, ti_cands)

    def _w_need(ti_):
        return (4 * ti_ * Np * c_isz       # W0^T in + merged-weight out
                + 2 * ti_ * rp * c_isz     # A
                + 2 * rp * Np * c_isz      # B (resident)
                + 4 * ti_ * 4)             # m in + scale out

    while _w_need(ti) > budget and ti > sub_c:
        ti //= 2
    if Kp // ti < 2:                       # let both v7x TensorCores take part
        half = Kp // 2
        if half >= sub_c and half % sub_c == 0:
            ti = half

    w_vmem = int(min(cap - (4 << 20), _w_need(ti) + (16 << 20)))
    mm_vmem = int(min(cap - (4 << 20), _mm_need(tm, tn, tk) + (16 << 20)))

    pass1_in_specs = [
        pl.BlockSpec((ti, Np), lambda i: (i, 0)),      # W0^T rows
        pl.BlockSpec((ti, rp), lambda i: (i, 0)),      # A rows
        pl.BlockSpec((rp, Np), lambda i: (0, 0)),      # B (resident)
        pl.BlockSpec((ti, 1), lambda i: (i, 0)),       # m rows
    ]
    mm_scratch = [] if nsteps_k == 1 else [pltpu.VMEM((tm, tn), jnp.float32)]

    if fuse:
        # Pass 1: only the (Kp, 1) scale vector.
        s = pl.pallas_call(
            functools.partial(_dora_scale_kernel, alpha=float(alpha)),
            out_shape=jax.ShapeDtypeStruct((Kp, 1), jnp.float32),
            grid_spec=pltpu.PrefetchScalarGridSpec(
                num_scalar_prefetch=0, grid=(Kp // ti,),
                in_specs=pass1_in_specs,
                out_specs=pl.BlockSpec((ti, 1), lambda i: (i, 0))),
            compiler_params=pltpu.CompilerParams(
                dimension_semantics=("parallel",), vmem_limit_bytes=w_vmem),
            cost_estimate=pl.CostEstimate(
                flops=2 * Kp * rp * Np + 3 * Kp * Np,
                transcendentals=Kp,
                bytes_accessed=(Kp * Np + Kp * rp + rp * Np) * c_isz + 8 * Kp),
        )(w0t_p, a_p, b_p, m_p)

        # Pass 2: weight tiles rebuilt on the fly (no (K,N) HBM round-trip).
        out_p = pl.pallas_call(
            functools.partial(_dora_fused_matmul_kernel, alpha=float(alpha),
                              nsteps_k=nsteps_k, compute_dtype=cdt),
            out_shape=jax.ShapeDtypeStruct((Mp, Np), out_dtype),
            grid_spec=pltpu.PrefetchScalarGridSpec(
                num_scalar_prefetch=0, grid=grid,
                in_specs=[
                    pl.BlockSpec((tm, tk), lambda i, j, k: (i, k)),   # x
                    pl.BlockSpec((tk, tn), lambda i, j, k: (k, j)),   # W0^T
                    pl.BlockSpec((tk, rp), lambda i, j, k: (k, 0)),   # A
                    pl.BlockSpec((rp, tn), lambda i, j, k: (0, j)),   # B
                    pl.BlockSpec((tk, 1), lambda i, j, k: (k, 0)),    # scale
                    pl.BlockSpec((1, tn), lambda i, j, k: (0, j)),    # bias
                ],
                out_specs=pl.BlockSpec((tm, tn), lambda i, j, k: (i, j)),
                scratch_shapes=mm_scratch),
            compiler_params=pltpu.CompilerParams(
                dimension_semantics=("parallel", "parallel", "arbitrary"),
                vmem_limit_bytes=mm_vmem),
            cost_estimate=pl.CostEstimate(
                flops=2 * Mp * Kp * Np
                + (Mp // tm) * (2 * Kp * rp * Np + 3 * Kp * Np),
                transcendentals=0,
                bytes_accessed=Mp * Kp * c_isz
                + (Mp // tm) * (Kp * Np + Kp * rp + rp * Np) * c_isz
                + 4 * Np + Mp * Np * o_isz),
        )(x_p, w0t_p, a_p, b_p, s, bias_p)
    else:
        # Pass 1: full merged + scaled weight (compute dtype, lane-dense).
        w_scaled = pl.pallas_call(
            functools.partial(_dora_weight_kernel, alpha=float(alpha)),
            out_shape=jax.ShapeDtypeStruct((Kp, Np), cdt),
            grid_spec=pltpu.PrefetchScalarGridSpec(
                num_scalar_prefetch=0, grid=(Kp // ti,),
                in_specs=pass1_in_specs,
                out_specs=pl.BlockSpec((ti, Np), lambda i: (i, 0))),
            compiler_params=pltpu.CompilerParams(
                dimension_semantics=("parallel",), vmem_limit_bytes=w_vmem),
            cost_estimate=pl.CostEstimate(
                flops=2 * Kp * rp * Np + 4 * Kp * Np,
                transcendentals=Kp,
                bytes_accessed=(2 * Kp * Np + Kp * rp + rp * Np) * c_isz
                + 4 * Kp),
        )(w0t_p, a_p, b_p, m_p)

        # Pass 2: classic (M, N, K)-tiled MXU matmul + bias.
        out_p = pl.pallas_call(
            functools.partial(_matmul_bias_kernel, nsteps_k=nsteps_k),
            out_shape=jax.ShapeDtypeStruct((Mp, Np), out_dtype),
            grid_spec=pltpu.PrefetchScalarGridSpec(
                num_scalar_prefetch=0, grid=grid,
                in_specs=[
                    pl.BlockSpec((tm, tk), lambda i, j, k: (i, k)),   # x
                    pl.BlockSpec((tk, tn), lambda i, j, k: (k, j)),   # weight
                    pl.BlockSpec((1, tn), lambda i, j, k: (0, j)),    # bias
                ],
                out_specs=pl.BlockSpec((tm, tn), lambda i, j, k: (i, j)),
                scratch_shapes=mm_scratch),
            compiler_params=pltpu.CompilerParams(
                dimension_semantics=("parallel", "parallel", "arbitrary"),
                vmem_limit_bytes=mm_vmem),
            cost_estimate=pl.CostEstimate(
                flops=2 * Mp * Kp * Np,
                transcendentals=0,
                bytes_accessed=(Mp * Kp + Kp * Np) * c_isz + 4 * Np
                + Mp * Np * o_isz),
        )(x_p, w_scaled, bias_p)

    out = out_p[:M, :out_features]
    return out.reshape(*lead, out_features)


# --------------------------------------------------------------------------- #
# Parameter init mirroring the PyTorch module + pure-JAX reference
# --------------------------------------------------------------------------- #
def init_dora_params(key, in_features, out_features, rank, b_init="normal"):
    k_w, k_b0, k_a, k_bb = jax.random.split(key, 4)
    bound = 1.0 / jnp.sqrt(jnp.float32(in_features))
    w0 = jax.random.uniform(k_w, (out_features, in_features), jnp.float32,
                            -bound, bound)
    bias = jax.random.uniform(k_b0, (out_features,), jnp.float32, -bound, bound)
    std = 1.0 / jnp.sqrt(jnp.float32(rank))
    A = jax.random.normal(k_a, (in_features, rank), jnp.float32) * std
    if b_init == "zeros":
        B = jnp.zeros((rank, out_features), jnp.float32)
    else:
        B = jax.random.normal(k_bb, (rank, out_features), jnp.float32)
    m = jnp.linalg.norm(w0, axis=0, keepdims=True)              # (1, in)
    return w0, bias, A, B, m


def dora_reference(x, w0, bias, A, B, m, alpha):
    hi = jax.lax.Precision.HIGHEST
    directional = w0 + alpha * jnp.dot(A, B, precision=hi).T     # (out, in)
    norm = jnp.linalg.norm(directional, axis=0, keepdims=True)   # (1, in)
    scaled = m * (directional / norm)                            # (out, in)
    x2d = x.reshape(-1, x.shape[-1])
    out = jnp.dot(x2d, scaled.T, precision=hi)
    if bias is not None:
        out = out + bias
    return out.reshape(*x.shape[:-1], w0.shape[0])


if __name__ == "__main__":
    key = jax.random.PRNGKey(0)
    k_x, k_p = jax.random.split(key)

    batch, seq, in_features, out_features, rank = 2, 8, 32, 48, 4
    alpha = 0.5

    x = jax.random.normal(k_x, (batch, seq, in_features), dtype=jnp.float32)
    w0, bias, A, B, m = init_dora_params(k_p, in_features, out_features, rank,
                                         b_init="normal")
    ref = dora_reference(x, w0, bias, A, B, m, alpha)

    # f32 compute path: exercise both the fused and two-pass kernels (tight).
    w_f32 = prepare_dora_weights(w0, bias, A, B, m, compute_dtype=jnp.float32)
    for fuse in (True, False):
        out = dora_forward(x, w_f32, alpha=alpha, out_features=out_features,
                           fuse=fuse)
        out = jax.block_until_ready(out)
        assert out.shape == (batch, seq, out_features)
        err = float(jnp.max(jnp.abs(out - ref)))
        assert jnp.allclose(out, ref, atol=3e-3, rtol=3e-3), (
            f"f32 path (fuse={fuse}) mismatch, max abs err {err:.3e}")

    # Default bf16 GEMM-operand path (f32 accumulation): looser tolerance.
    w_bf16 = prepare_dora_weights(w0, bias, A, B, m,
                                  compute_dtype=jnp.bfloat16)
    for fuse in (None, False):
        out = dora_forward(x, w_bf16, alpha=alpha, out_features=out_features,
                           fuse=fuse)
        out = jax.block_until_ready(out)
        assert out.shape == (batch, seq, out_features)
        err = float(jnp.max(jnp.abs(out - ref)))
        assert jnp.allclose(out, ref, atol=5e-2, rtol=5e-2), (
            f"bf16 path (fuse={fuse}) mismatch, max abs err {err:.3e}")

    print("KERNEL_OK")
</pallas_src>

<mosaic_0001>
module attributes {stable_mosaic.version = 11 : i64} {
  func.func @_dora_scale_kernel(%arg0: i32, %arg1: memref<64x128xf32, #tpu.memory_space<vmem>>, %arg2: memref<64x8xf32, #tpu.memory_space<vmem>>, %arg3: memref<8x128xf32, #tpu.memory_space<vmem>>, %arg4: memref<64x1xf32, #tpu.memory_space<vmem>>, %arg5: memref<64x1xf32, #tpu.memory_space<vmem>>) attributes {dimension_semantics = [#tpu.dimension_semantics<parallel>], iteration_bounds = array<i64: 2>, scalar_prefetch = 0 : i64, scratch_operands = 0 : i64, tpu.core_type = #tpu.core_type<tc>, window_params = [{transform_indices = @transform_0, window_bounds = array<i64: 64, 128>}, {transform_indices = @transform_1, window_bounds = array<i64: 64, 8>}, {pipeline_mode = #tpu.pipeline_mode<synchronous>, transform_indices = @transform_2, window_bounds = array<i64: 8, 128>}, {transform_indices = @transform_3, window_bounds = array<i64: 64, 1>}, {transform_indices = @transform_4, window_bounds = array<i64: 64, 1>}]} {
    %c0 = arith.constant 0 : index
    %c0_0 = arith.constant 0 : index
    %0 = vector.load %arg2[%c0, %c0_0] : memref<64x8xf32, #tpu.memory_space<vmem>>, vector<64x8xf32>
    %c0_1 = arith.constant 0 : index
    %c0_2 = arith.constant 0 : index
    %1 = vector.load %arg3[%c0_1, %c0_2] : memref<8x128xf32, #tpu.memory_space<vmem>>, vector<8x128xf32>
    %cst = arith.constant dense<0.000000e+00> : vector<64x128xf32>
    %2 = tpu.matmul %0, %1, %cst {dimension_numbers = #tpu.dot_dimension_numbers<[1], [0], [0], [1], [0, 0, 1, 1], [], []>} : vector<64x8xf32>, vector<8x128xf32>, vector<64x128xf32> -> vector<64x128xf32>
    %c0_3 = arith.constant 0 : index
    %c0_4 = arith.constant 0 : index
    %3 = vector.load %arg1[%c0_3, %c0_4] : memref<64x128xf32, #tpu.memory_space<vmem>>, vector<64x128xf32>
    %cst_5 = arith.constant 5.000000e-01 : f32
    %4 = vector.broadcast %cst_5 : f32 to vector<64x128xf32>
    %5 = arith.mulf %4, %2 : vector<64x128xf32>
    %6 = arith.addf %3, %5 : vector<64x128xf32>
    %7 = arith.mulf %6, %6 : vector<64x128xf32>
    %cst_6 = arith.constant dense<0.000000e+00> : vector<64xf32>
    %8 = vector.multi_reduction <add>, %7, %cst_6 [1] : vector<64x128xf32> to vector<64xf32>
    %9 = vector.shape_cast %8 : vector<64xf32> to vector<64x1xf32>
    %cst_7 = arith.constant 0.000000e+00 : f32
    %10 = vector.broadcast %cst_7 : f32 to vector<64x1xf32>
    %11 = arith.cmpf ogt, %9, %10 : vector<64x1xf32>
    %c0_8 = arith.constant 0 : index
    %c0_9 = arith.constant 0 : index
    %12 = vector.load %arg4[%c0_8, %c0_9] : memref<64x1xf32, #tpu.memory_space<vmem>>, vector<64x1xf32>
    %13 = math.rsqrt %9 : vector<64x1xf32>
    %14 = arith.mulf %12, %13 : vector<64x1xf32>
    %cst_10 = arith.constant 0.000000e+00 : f32
    %15 = vector.broadcast %cst_10 : f32 to vector<64x1xf32>
    %16 = arith.select %11, %14, %15 : vector<64x1xi1>, vector<64x1xf32>
    %c0_11 = arith.constant 0 : index
    %c0_12 = arith.constant 0 : index
    %17 = vector.load %arg5[%c0_11, %c0_12] : memref<64x1xf32, #tpu.memory_space<vmem>>, vector<64x1xf32>
    tpu.vector_store %arg5[%c0_11, %c0_12], %16 {strides = array<i32>} : memref<64x1xf32, #tpu.memory_space<vmem>>, vector<64x1xf32>,
    return
  }
  func.func @transform_0(%arg0: i32) -> (i32, i32) {
    %c0_i32 = arith.constant 0 : i32
    %c0_i32_0 = arith.constant 0 : i32
    return %arg0, %c0_i32 : i32, i32
  }
  func.func @transform_1(%arg0: i32) -> (i32, i32) {
    %c0_i32 = arith.constant 0 : i32
    %c0_i32_0 = arith.constant 0 : i32
    return %arg0, %c0_i32 : i32, i32
  }
  func.func @transform_2(%arg0: i32) -> (i32, i32) {
    %c0_i32 = arith.constant 0 : i32
    %c0_i32_0 = arith.constant 0 : i32
    %c0_i32_1 = arith.constant 0 : i32
    return %c0_i32, %c0_i32_0 : i32, i32
  }
  func.func @transform_3(%arg0: i32) -> (i32, i32) {
    %c0_i32 = arith.constant 0 : i32
    %c0_i32_0 = arith.constant 0 : i32
    return %arg0, %c0_i32 : i32, i32
  }
  func.func @transform_4(%arg0: i32) -> (i32, i32) {
    %c0_i32 = arith.constant 0 : i32
    %c0_i32_0 = arith.constant 0 : i32
    return %arg0, %c0_i32 : i32, i32
  }
}

module attributes {stable_mosaic.version = 11 : i64} {
  func.func @_dora_fused_matmul_kernel(%arg0: i32, %arg1: i32, %arg2: i32, %arg3: memref<16x128xf32, #tpu.memory_space<vmem>>, %arg4: memref<128x128xf32, #tpu.memory_space<vmem>>, %arg5: memref<128x8xf32, #tpu.memory_space<vmem>>, %arg6: memref<8x128xf32, #tpu.memory_space<vmem>>, %arg7: memref<128x1xf32, #tpu.memory_space<vmem>>, %arg8: memref<1x128xf32, #tpu.memory_space<vmem>>, %arg9: memref<16x128xf32, #tpu.memory_space<vmem>>) attributes {dimension_semantics = [#tpu.dimension_semantics<parallel>, #tpu.dimension_semantics<parallel>, #tpu.dimension_semantics<arbitrary>], iteration_bounds = array<i64: 1, 1, 1>, scalar_prefetch = 0 : i64, scratch_operands = 0 : i64, tpu.core_type = #tpu.core_type<tc>, window_params = [{transform_indices = @transform_0, window_bounds = array<i64: 16, 128>}, {transform_indices = @transform_1, window_bounds = array<i64: 128, 128>}, {transform_indices = @transform_2, window_bounds = array<i64: 128, 8>}, {transform_indices = @transform_3, window_bounds = array<i64: 8, 128>}, {transform_indices = @transform_4, window_bounds = array<i64: 128, 1>}, {transform_indices = @transform_5, window_bounds = array<i64: 1, 128>}, {transform_indices = @transform_6, window_bounds = array<i64: 16, 128>}]} {
    %c0 = arith.constant 0 : index
    %c0_0 = arith.constant 0 : index
    %0 = vector.load %arg5[%c0, %c0_0] : memref<128x8xf32, #tpu.memory_space<vmem>>, vector<128x8xf32>
    %c0_1 = arith.constant 0 : index
    %c0_2 = arith.constant 0 : index
    %1 = vector.load %arg6[%c0_1, %c0_2] : memref<8x128xf32, #tpu.memory_space<vmem>>, vector<8x128xf32>
    %cst = arith.constant dense<0.000000e+00> : vector<128x128xf32>
    %2 = tpu.matmul %0, %1, %cst {dimension_numbers = #tpu.dot_dimension_numbers<[1], [0], [0], [1], [0, 0, 1, 1], [], []>} : vector<128x8xf32>, vector<8x128xf32>, vector<128x128xf32> -> vector<128x128xf32>
    %c0_3 = arith.constant 0 : index
    %c0_4 = arith.constant 0 : index
    %3 = vector.load %arg4[%c0_3, %c0_4] : memref<128x128xf32, #tpu.memory_space<vmem>>, vector<128x128xf32>
    %cst_5 = arith.constant 5.000000e-01 : f32
    %4 = vector.broadcast %cst_5 : f32 to vector<128x128xf32>
    %5 = arith.mulf %4, %2 : vector<128x128xf32>
    %6 = arith.addf %3, %5 : vector<128x128xf32>
    %c0_6 = arith.constant 0 : index
    %c0_7 = arith.constant 0 : index
    %7 = vector.load %arg7[%c0_6, %c0_7] : memref<128x1xf32, #tpu.memory_space<vmem>>, vector<128x1xf32>
    %8 = vector.broadcast %7 : vector<128x1xf32> to vector<128x128xf32>
    %9 = arith.mulf %6, %8 : vector<128x128xf32>
    %c0_8 = arith.constant 0 : index
    %c0_9 = arith.constant 0 : index
    %10 = vector.load %arg3[%c0_8, %c0_9] : memref<16x128xf32, #tpu.memory_space<vmem>>, vector<16x128xf32>
    %cst_10 = arith.constant dense<0.000000e+00> : vector<16x128xf32>
    %11 = tpu.matmul %10, %9, %cst_10 {dimension_numbers = #tpu.dot_dimension_numbers<[1], [0], [0], [1], [0, 0, 1, 1], [], []>} : vector<16x128xf32>, vector<128x128xf32>, vector<16x128xf32> -> vector<16x128xf32>
    %c0_11 = arith.constant 0 : index
    %c0_12 = arith.constant 0 : index
    %12 = vector.load %arg8[%c0_11, %c0_12] : memref<1x128xf32, #tpu.memory_space<vmem>>, vector<1x128xf32>
    %13 = vector.broadcast %12 : vector<1x128xf32> to vector<16x128xf32>
    %14 = arith.addf %11, %13 : vector<16x128xf32>
    %c0_13 = arith.constant 0 : index
    %c0_14 = arith.constant 0 : index
    %15 = vector.load %arg9[%c0_13, %c0_14] : memref<16x128xf32, #tpu.memory_space<vmem>>, vector<16x128xf32>
    tpu.vector_store %arg9[%c0_13, %c0_14], %14 {strides = array<i32>} : memref<16x128xf32, #tpu.memory_space<vmem>>, vector<16x128xf32>,
    return
  }
  func.func @transform_0(%arg0: i32, %arg1: i32, %arg2: i32) -> (i32, i32) {
    %c0_i32 = arith.constant 0 : i32
    return %arg0, %arg2 : i32, i32
  }
  func.func @transform_1(%arg0: i32, %arg1: i32, %arg2: i32) -> (i32, i32) {
    %c0_i32 = arith.constant 0 : i32
    return %arg2, %arg1 : i32, i32
  }
  func.func @transform_2(%arg0: i32, %arg1: i32, %arg2: i32) -> (i32, i32) {
    %c0_i32 = arith.constant 0 : i32
    %c0_i32_0 = arith.constant 0 : i32
    return %arg2, %c0_i32 : i32, i32
  }
  func.func @transform_3(%arg0: i32, %arg1: i32, %arg2: i32) -> (i32, i32) {
    %c0_i32 = arith.constant 0 : i32
    %c0_i32_0 = arith.constant 0 : i32
    return %c0_i32, %arg1 : i32, i32
  }
  func.func @transform_4(%arg0: i32, %arg1: i32, %arg2: i32) -> (i32, i32) {
    %c0_i32 = arith.constant 0 : i32
    %c0_i32_0 = arith.constant 0 : i32
    return %arg2, %c0_i32 : i32, i32
  }
  func.func @transform_5(%arg0: i32, %arg1: i32, %arg2: i32) -> (i32, i32) {
    %c0_i32 = arith.constant 0 : i32
    %c0_i32_0 = arith.constant 0 : i32
    return %c0_i32, %arg1 : i32, i32
  }
  func.func @transform_6(%arg0: i32, %arg1: i32, %arg2: i32) -> (i32, i32) {
    %c0_i32 = arith.constant 0 : i32
    return %arg0, %arg1 : i32, i32
  }
}

</mosaic_0001>

<bundles_post_ra>
// kernel: dora_forward.3
= control target key start
LH: loop header
LB: loop body
LE: loop exit
PB: predicated region body
PF: predicated region fallthrough
CT: control target
= control target key end

     0   :  { %vm40_vm0 = vcmask 64512   ;;  %v600_v3 = vmov 0   ;;  %s832_s3 = inlined_call_operand.vmem [shape: f32[8,128], index: 3, kind: input, shape index: {}]   ;;  %s833_s2 = inlined_call_operand.vmem [shape: f32[128,8], index: 2, kind: input, shape index: {}]   ;;  %s834_s4 = inlined_call_operand.vmem [shape: f32[128,1], index: 4, kind: input, shape index: {}]   ;;  %s835_s0 = inlined_call_operand.vmem [shape: f32[16,128], index: 0, kind: input, shape index: {}]   ;;  %s836_s1 = inlined_call_operand.vmem [shape: f32[128,128], index: 1, kind: input, shape index: {}]   ;;  %s837_s5 = inlined_call_operand.vmem [shape: f32[1,128], index: 5, kind: input, shape index: {}]   ;;  %s838_s6 = inlined_call_operand.vmem [shape: f32[16,128], index: 6, kind: output, shape index: {}]  }
   0x1   :  { %v39_v0 = vld [vmem:[%s832_s3] sm:$0xff]  ;;  %v24_v2 = vld [vmem:[%s833_s2 + $0x8] sm:$0xff]  ;;  %598 = vset.pattern.permute.xlu0 %v600_v3  ;;  %599 = vset.pattern.permute.xlu1 %v600_v3  ;;  %v25_v4 = vld [vmem:[%s833_s2 + $0x10] sm:$0xff] }
   0x2   :  { %v23_v1 = vld [vmem:[%s833_s2] sm:$0xff]  ;;  %536 = vmatprep.subr.mxu0 %v39_v0  ;;  %v26_v5 = vld [vmem:[%s833_s2 + $0x18] sm:$0xff]  ;;  %v295_v8 = vld [vmem:[%s834_s4 + $0x68] sm:$0xff] }
   0x3   :  { %538 = vmatprep.mubr.msk.f32.mxu0 %vm40_vm0, %v23_v1  ;;  %537 = vmatpush3.msra.mxu0 %v39_v0  ;;  %v27_v6 = vld [vmem:[%s833_s2 + $0x20] sm:$0xff]  ;;  %v297_v7 = vld [vmem:[%s834_s4 + $0x78] sm:$0xff]  ;;  %v296_v9 = vld [vmem:[%s834_s4 + $0x70] sm:$0xff] }
   0x4   :  { %539 = vmatmul.mubr.msk.f32.vlgmr.msra.gmra.mxu0 %vm40_vm0, %v24_v2  ;;  %375 = vperm.xlu0 %598, %v297_v7   ;;  %v28_v10 = vld [vmem:[%s833_s2 + $0x28] sm:$0xff]  ;;  %v294_v11 = vld [vmem:[%s834_s4 + $0x60] sm:$0xff]  ;;  %v29_v12 = vld [vmem:[%s833_s2 + $0x30] sm:$0xff] }
   0x5   :  { %541 = vmatprep.mubr.msk.f32.mxu0 %vm40_vm0, %v25_v4  ;;  %365 = vperm.xlu1 %599, %v295_v8   ;;  %v293_v13 = vld [vmem:[%s834_s4 + $0x58] sm:$0xff]  ;;  %v292_v15 = vld [vmem:[%s834_s4 + $0x50] sm:$0xff]  ;;  %v31_v16 = vld [vmem:[%s833_s2 + $0x40] sm:$0xff] }
   0x6   :  { %v30_v14 = vld [vmem:[%s833_s2 + $0x38] sm:$0xff]  ;;  %v291_v17 = vld [vmem:[%s834_s4 + $0x48] sm:$0xff]  ;;  %v290_v19 = vld [vmem:[%s834_s4 + $0x40] sm:$0xff] }
   0x7   :  { %v32_v18 = vld [vmem:[%s833_s2 + $0x48] sm:$0xff]  ;;  %v33_v20 = vld [vmem:[%s833_s2 + $0x50] sm:$0xff]  ;;  %v289_v21 = vld [vmem:[%s834_s4 + $0x38] sm:$0xff] }
   0x8   :  { %542 = vmatmul.mubr.msk.f32.gmra.mxu0 %vm40_vm0, %v26_v5  ;;  %370 = vperm.xlu0 %598, %v296_v9   ;;  %v34_v22 = vld [vmem:[%s833_s2 + $0x58] sm:$0xff]  ;;  %v288_v23 = vld [vmem:[%s834_s4 + $0x30] sm:$0xff]  ;;  %v35_v24 = vld [vmem:[%s833_s2 + $0x60] sm:$0xff] }
   0x9   :  { %544 = vmatprep.mubr.msk.f32.mxu0 %vm40_vm0, %v27_v6  ;;  %360 = vperm.xlu1 %599, %v294_v11   ;;  %v287_v25 = vld [vmem:[%s834_s4 + $0x28] sm:$0xff]  ;;  %v286_v27 = vld [vmem:[%s834_s4 + $0x20] sm:$0xff]  ;;  %v37_v28 = vld [vmem:[%s833_s2 + $0x70] sm:$0xff] }
   0xa   :  { %v36_v26 = vld [vmem:[%s833_s2 + $0x68] sm:$0xff]  ;;  %v285_v29 = vld [vmem:[%s834_s4 + $0x18] sm:$0xff]  ;;  %v284_v31 = vld [vmem:[%s834_s4 + $0x10] sm:$0xff] }
   0xb   :  { %v38_v30 = vld [vmem:[%s833_s2 + $0x78] sm:$0xff]  ;;  %v283_v32 = vld [vmem:[%s834_s4 + $0x8] sm:$0xff]  ;;  %v282_v33 = vld [vmem:[%s834_s4] sm:$0xff] }
   0xc   :  { %545 = vmatmul.mubr.msk.f32.gmra.mxu0 %vm40_vm0, %v28_v10  ;;  %355 = vperm.xlu0 %598, %v293_v13   ;;  %v394_v34 = vld [vmem:[%s835_s0] sm:$0xff]  ;;  %v249_v55 = vld [vmem:[%s836_s1 + $0x78] sm:$0xff]  ;;  %v247_v59 = vld [vmem:[%s836_s1 + $0x68] sm:$0xff] }
   0xd   :  { %547 = vmatprep.mubr.msk.f32.mxu0 %vm40_vm0, %v29_v12  ;;  %350 = vperm.xlu1 %599, %v292_v15   ;;  %v248_v61 = vld [vmem:[%s836_s1 + $0x70] sm:$0xff]  ;;  %v246_v1 = vld [vmem:[%s836_s1 + $0x60] sm:$0xff]  ;;  %v245_v7 = vld [vmem:[%s836_s1 + $0x58] sm:$0xff] }
   0xe   :  { %594 = vmatprep.mubr.f32.mxu1 %v394_v34  ;;  %v244_v12 = vld [vmem:[%s836_s1 + $0x50] sm:$0xff] }
  0x10   :  { %548 = vmatmul.mubr.msk.f32.gmra.mxu0 %vm40_vm0, %v30_v14  ;;  %345 = vperm.xlu0 %598, %v291_v17  }
  0x11   :  { %550 = vmatprep.mubr.msk.f32.mxu0 %vm40_vm0, %v31_v16  ;;  %340 = vperm.xlu1 %599, %v290_v19   ;;  %v243_v16 = vld [vmem:[%s836_s1 + $0x48] sm:$0xff] }
  0x14   :  { %551 = vmatmul.mubr.msk.f32.gmra.mxu0 %vm40_vm0, %v32_v18  ;;  %335 = vperm.xlu0 %598, %v289_v21   ;;  %v242_v21 = vld [vmem:[%s836_s1 + $0x40] sm:$0xff] }
  0x15   :  { %553 = vmatprep.mubr.msk.f32.mxu0 %vm40_vm0, %v33_v20  ;;  %330 = vperm.xlu1 %599, %v288_v23  }
  0x18   :  { %554 = vmatmul.mubr.msk.f32.gmra.mxu0 %vm40_vm0, %v34_v22  ;;  %325 = vperm.xlu0 %598, %v287_v25  }
  0x19   :  { %556 = vmatprep.mubr.msk.f32.mxu0 %vm40_vm0, %v35_v24  ;;  %320 = vperm.xlu1 %599, %v286_v27  }
  0x1c   :  { %557 = vmatmul.mubr.msk.f32.gmra.mxu0 %vm40_vm0, %v36_v26  ;;  %315 = vperm.xlu0 %598, %v285_v29   ;;  %v241_v26 = vld [vmem:[%s836_s1 + $0x38] sm:$0xff] }
  0x1d   :  { %559 = vmatprep.mubr.msk.f32.mxu0 %vm40_vm0, %v37_v28  ;;  %310 = vperm.xlu1 %599, %v284_v31  }
  0x20   :  { %560 = vmatmul.mubr.msk.f32.gmra.mxu0 %vm40_vm0, %v38_v30  ;;  %305 = vperm.xlu0 %598, %v283_v32   ;;  %v240_v30 = vld [vmem:[%s836_s1 + $0x30] sm:$0xff] }
  0x21   :  { %300 = vperm.xlu1 %599, %v282_v33  }
  0x7f   :  { %v376_v43 = vpop.permute.xlu0 %375 }
  0x80   :  { %v366_v45 = vpop.permute.xlu1 %365 }
  0x83   :  { %v371_v48 = vpop.permute.xlu0 %370 }
  0x84   :  { %v361_v50 = vpop.permute.xlu1 %360 }
  0x87   :  { %v356_v53 = vpop.permute.xlu0 %355 }
  0x88   :  { %v351_v58 = vpop.permute.xlu1 %350 }
  0x8b   :  { %v346_v6 = vpop.permute.xlu0 %345 }
  0x8c   :  { %v341_v11 = vpop.permute.xlu1 %340 }
  0x8f   :  { %v336_v20 = vpop.permute.xlu0 %335 }
  0x90   :  { %v331_v25 = vpop.permute.xlu1 %330 }
  0x93   :  { %v326_v34 = vpop.permute.xlu0 %325 }
  0xc4   :  { %v754_v35 = vpop.f32.mrf.mxu0 }
  0xc6   :  { %v756_v36 = vpop.f32.mrf.mxu0 }
  0xc8   :  { %v758_v37 = vpop.f32.mrf.mxu0 }
  0xca   :  { %v760_v38 = vpop.f32.mrf.mxu0 }
  0xcc   :  { %v762_v39 = vpop.f32.mrf.mxu0 }
  0xcd   :  { %v255_v31 = vmul.f32 0.5, %v762_v39  ;;  %v253_v39 = vmul.f32 0.5, %v758_v37  ;;  %v251_v37 = vmul.f32 0.5, %v754_v35 }
  0xce   :  { %v764_v40 = vpop.f32.mrf.mxu0 }
  0xd0   :  { %v549_v41 = vpop.f32.mrf.mxu0 }
  0xd1   :  { %v257_v22 = vmul.f32 0.5, %v549_v41  ;;  %v239_v41 = vld [vmem:[%s836_s1 + $0x28] sm:$0xff] }
  0xd2   :  { %v185_v42 = vpop.f32.mrf.mxu0 }
  0xd3   :  { %v256_v27 = vmul.f32 0.5, %v185_v42  ;;  %v273_v32 = vadd.f32 %v257_v22, %v241_v26  ;;  %v254_v42 = vmul.f32 0.5, %v764_v40  ;;  %v252_v40 = vmul.f32 0.5, %v760_v38 }
  0xd4   :  { %v552_v44 = vpop.f32.mrf.mxu0  ;;  %v250_v38 = vmul.f32 0.5, %v756_v36 }
  0xd5   :  { %v259_v13 = vmul.f32 0.5, %v552_v44 }
  0xd6   :  { %v195_v46 = vpop.f32.mrf.mxu0 }
  0xd7   :  { %v258_v17 = vmul.f32 0.5, %v195_v46  ;;  %v275_v23 = vadd.f32 %v259_v13, %v243_v16  ;;  %v238_v46 = vld [vmem:[%s836_s1 + $0x20] sm:$0xff] }
  0xd8   :  { %v555_v47 = vpop.f32.mrf.mxu0 }
  0xd9   :  { %v261_v2 = vmul.f32 0.5, %v555_v47  ;;  %v274_v28 = vadd.f32 %v258_v17, %v242_v21  ;;  %v387_v33 = vmul.f32 %v346_v6, %v275_v23  ;;  %v271_v47 = vadd.f32 %v255_v31, %v239_v41 }
  0xda   :  { %v205_v49 = vpop.f32.mrf.mxu0 }
  0xdb   :  { %v260_v8 = vmul.f32 0.5, %v205_v49  ;;  %v277_v14 = vadd.f32 %v261_v2, %v245_v7  ;;  %v386_v44 = vmul.f32 %v341_v11, %v274_v28  ;;  %v237_v49 = vld [vmem:[%s836_s1 + $0x18] sm:$0xff] }
  0xdc   :  { %v558_v51 = vpop.f32.mrf.mxu0 }
  0xdd   :  { %v263_v56 = vmul.f32 0.5, %v558_v51  ;;  %v276_v18 = vadd.f32 %v260_v8, %v244_v12  ;;  %v389_v24 = vmul.f32 %v356_v53, %v277_v14  ;;  %v236_v53 = vld [vmem:[%s836_s1 + $0x10] sm:$0xff] }
  0xde   :  { %v215_v52 = vpop.f32.mrf.mxu0 }
  0xdf   :  { %v262_v62 = vmul.f32 0.5, %v215_v52  ;;  %v279_v3 = vadd.f32 %v263_v56, %v247_v59  ;;  %v388_v29 = vmul.f32 %v351_v58, %v276_v18  ;;  %v316_v52 = vpop.permute.xlu0 %315  ;;  %v268_v58 = vadd.f32 %v252_v40, %v236_v53 }
  0xe0   :  { %v561_v54 = vpop.f32.mrf.mxu0 }
  0xe1   :  { %v265_v57 = vmul.f32 0.5, %v561_v54  ;;  %v278_v9 = vadd.f32 %v262_v62, %v246_v1  ;;  %v391_v15 = vmul.f32 %v366_v45, %v279_v3  ;;  %v321_v45 = vpop.permute.xlu1 %320  ;;  %v269_v54 = vadd.f32 %v253_v39, %v237_v49  ;;  %v395_v3 = vld [vmem:[%s835_s0 + $0x8] sm:$0xff] }
  0xe2   :  { %v225_v60 = vpop.f32.mrf.mxu0 }
  0xe3   :  { %v281_v63 = vadd.f32 %v265_v57, %v249_v55  ;;  %v264_v0 = vmul.f32 0.5, %v225_v60  ;;  %v390_v19 = vmul.f32 %v361_v50, %v278_v9  ;;  %v270_v50 = vadd.f32 %v254_v42, %v238_v46  ;;  %v235_v57 = vld [vmem:[%s836_s1 + $0x8] sm:$0xff]  ;;  %v234_v60 = vld [vmem:[%s836_s1] sm:$0xff]  ;;  %v306_v62 = vpop.permute.xlu0 %305 }
  0xe4   :  { %v383_v55 = vmul.f32 %v326_v34, %v271_v47  ;;  %v267_v35 = vadd.f32 %v251_v37, %v235_v57 }
  0xe5   :  { %v280_v4 = vadd.f32 %v264_v0, %v248_v61  ;;  %v393_v5 = vmul.f32 %v376_v43, %v281_v63  ;;  %v272_v43 = vadd.f32 %v256_v27, %v240_v30  ;;  %v311_v56 = vpop.permute.xlu1 %310  ;;  %v382_v59 = vmul.f32 %v321_v45, %v270_v50 }
  0xe6   :  { %v381_v61 = vmul.f32 %v316_v52, %v269_v54  ;;  %v266_v63 = vadd.f32 %v250_v38, %v234_v60  ;;  %v380_v0 = vmul.f32 %v311_v56, %v268_v58  ;;  %v379_v2 = vmul.f32 %v306_v62, %v267_v35 }
  0xe7   :  { %v392_v10 = vmul.f32 %v371_v48, %v280_v4  ;;  %562 = vmatprep.subr.mxu1 %v393_v5  ;;  %v385_v48 = vmul.f32 %v336_v20, %v273_v32  ;;  %v384_v51 = vmul.f32 %v331_v25, %v272_v43  ;;  %v500_v4 = vld [vmem:[%s837_s5] ss:$0 sm:$0xff] }
  0xe8   :  { %563 = vmatpush3.msra.mxu1 %v393_v5 }
  0xe9   :  { %564 = vmatprep.subr.mxu1 %v392_v10  ;;  %v301_v1 = vpop.permute.xlu1 %300 }
  0xea   :  { %565 = vmatpush3.msra.mxu1 %v392_v10  ;;  %v378_v36 = vmul.f32 %v301_v1, %v266_v63 }
  0xeb   :  { %566 = vmatprep.subr.mxu1 %v391_v15 }
  0xec   :  { %567 = vmatpush3.msra.mxu1 %v391_v15 }
  0xed   :  { %568 = vmatprep.subr.mxu1 %v390_v19 }
  0xee   :  { %569 = vmatpush3.msra.mxu1 %v390_v19 }
  0xef   :  { %570 = vmatprep.subr.mxu1 %v389_v24 }
  0xf0   :  { %571 = vmatpush3.msra.mxu1 %v389_v24 }
  0xf1   :  { %572 = vmatprep.subr.mxu1 %v388_v29 }
  0xf2   :  { %573 = vmatpush3.msra.mxu1 %v388_v29 }
  0xf3   :  { %574 = vmatprep.subr.mxu1 %v387_v33 }
  0xf4   :  { %575 = vmatpush3.msra.mxu1 %v387_v33 }
  0xf5   :  { %576 = vmatprep.subr.mxu1 %v386_v44 }
  0xf6   :  { %577 = vmatpush3.msra.mxu1 %v386_v44 }
  0xf7   :  { %578 = vmatprep.subr.mxu1 %v385_v48 }
  0xf8   :  { %579 = vmatpush3.msra.mxu1 %v385_v48 }
  0xf9   :  { %580 = vmatprep.subr.mxu1 %v384_v51 }
  0xfa   :  { %581 = vmatpush3.msra.mxu1 %v384_v51 }
  0xfb   :  { %582 = vmatprep.subr.mxu1 %v383_v55 }
  0xfc   :  { %583 = vmatpush3.msra.mxu1 %v383_v55 }
  0xfd   :  { %584 = vmatprep.subr.mxu1 %v382_v59 }
  0xfe   :  { %585 = vmatpush3.msra.mxu1 %v382_v59 }
  0xff   :  { %586 = vmatprep.subr.mxu1 %v381_v61 }
 0x100   :  { %587 = vmatpush3.msra.mxu1 %v381_v61 }
 0x101   :  { %588 = vmatprep.subr.mxu1 %v380_v0 }
 0x102   :  { %589 = vmatpush3.msra.mxu1 %v380_v0 }
 0x103   :  { %590 = vmatprep.subr.mxu1 %v379_v2 }
 0x104   :  { %591 = vmatpush3.msra.mxu1 %v379_v2 }
 0x105   :  { %592 = vmatprep.subr.mxu1 %v378_v36 }
 0x106   :  { %593 = vmatpush3.msra.mxu1 %v378_v36 }
 0x107   :  { %595 = vmatmul.mubr.f32.vlgmr.msra.gmra.mxu1 %v395_v3 }
 0x1c7   :  { %v596_v5 = vpop.f32.mrf.mxu1 }
 0x1c8   :  { %v475_v6 = vadd.f32 %v596_v5, %v500_v4 }
 0x1c9   :  { %v469_v7 = vpop.f32.mrf.mxu1 }
 0x1ca   :  { %479 = vst [vmem:[%s838_s6 + $0x8] sm:$0xff] %v475_v6  ;;  %v470_v8 = vadd.f32 %v500_v4, %v469_v7 }
 0x1cc   :  { %478 = vst [vmem:[%s838_s6] sm:$0xff] %v470_v8 }

// kernel: dora_forward.2
= control target key start
LH: loop header
LB: loop body
LE: loop exit
PB: predicated region body
PF: predicated region fallthrough
CT: control target
= control target key end

     0   :  { %s666_s15 = smov 0   ;;  %s744_s0 = inlined_call_operand.vmem [shape: f32[128,128], index: 0, kind: input, shape index: {}]   ;;  %s745_s1 = inlined_call_operand.vmem [shape: f32[128,8], index: 1, kind: input, shape index: {}]   ;;  %s746_s2 = inlined_call_operand.vmem [shape: f32[8,128], index: 2, kind: input, shape index: {}]   ;;  %s747_s3 = inlined_call_operand.vmem [shape: f32[128,1], index: 3, kind: input, shape index: {}]   ;;  %s748_s4 = inlined_call_operand.vmem [shape: f32[128,1], index: 4, kind: output, shape index: {}]  }
   0x1 LB: > { %s561_s16 = sadd.s32 4294967295, %s639_s15   ;;  %p565_p0 = scmp.ge.s32.totalorder %s639_s15, 1  ;;  %s639_s15 = sphi %s666_s15, %s14_s15  }
   0x2   : > { %p185_p1 = scmp.lt.s32.totalorder %s639_s15, 3 }
   0x4   : > { %p186_p2 = pnand %p565_p0, %p185_p1 }
   0x5   : > { %s566_s19 = sshll.u32 (!%p186_p2), %s561_s16, 3 }
   0x6   : > { %189 = sbr.rel (%p186_p2) target bundleno = 385 (0x181), region = 36  ;;  %p222_p3 = scmp.lt.s32.totalorder (!%p186_p2), %s566_s19, 15 }
   0xb   : > { %v253_v0 = vld [vmem:[%s746_s2] sm:$0xff]  ;;  %s750_s19 = smov (!%p222_p3, %s566_s19), 15  ;;  %vm254_vm0 = vcmask 64512   ;;  %vm472_vm1 = vcmask 7168  }
   0xc   : > { %593 = vmatprep.subr.mxu0 %v253_v0  ;;  %607 = vmatprep.subr.mxu1 %v253_v0  ;;  %s677_s20 = sshll.u32 %s750_s19, 3 }
   0xd   : > { %594 = vmatpush3.msra.mxu0 %v253_v0  ;;  %608 = vmatpush3.msra.mxu1 %v253_v0  ;;  %s231_s23 = scalar_lea.vmem %s745_s1, %s677_s20  ;;  %s695_s26 = scalar_lea.vmem %s744_s0, %s677_s20 }
   0xe   : > { %v245_v1 = vld [vmem:[%s231_s23] sm:$0xff]  ;;  %v246_v3 = vld [vmem:[%s231_s23 + $0x8] sm:$0xff]  ;;  %v247_v5 = vld [vmem:[%s231_s23 + $0x10] sm:$0xff]  ;;  %s709_s29 = scalar_lea.vmem %s747_s3, %s677_s20  ;;  %s717_s6 = scalar_lea.vmem %s748_s4, %s677_s20 }
   0xf   : > { %v249_v2 = vld [vmem:[%s231_s23 + $0x20] sm:$0xff]  ;;  %595 = vmatprep.mubr.msk.f32.mxu0 %vm254_vm0, %v245_v1  ;;  %v250_v4 = vld [vmem:[%s231_s23 + $0x28] sm:$0xff]  ;;  %v251_v6 = vld [vmem:[%s231_s23 + $0x30] sm:$0xff] }
  0x10   : > { %601 = vmatprep.mubr.msk.f32.mxu1 %vm254_vm0, %v249_v2  ;;  %596 = vmatmul.mubr.msk.f32.vlgmr.msra.gmra.mxu0 %vm254_vm0, %v246_v3  ;;  %v248_v7 = vld [vmem:[%s231_s23 + $0x18] sm:$0xff]  ;;  %v389_v11 = vld [vmem:[%s695_s26 + $0x28] sm:$0xff]  ;;  %v384_v20 = vld [vmem:[%s695_s26] sm:$0xff] }
  0x11   : > { %602 = vmatmul.mubr.msk.f32.vlgmr.msra.gmra.mxu1 %vm254_vm0, %v250_v4  ;;  %598 = vmatprep.mubr.msk.f32.mxu0 %vm254_vm0, %v247_v5  ;;  %v252_v8 = vld [vmem:[%s231_s23 + $0x38] sm:$0xff]  ;;  %v385_v12 = vld [vmem:[%s695_s26 + $0x8] sm:$0xff]  ;;  %v388_v28 = vld [vmem:[%s695_s26 + $0x20] sm:$0xff] }
  0x12   : > { %604 = vmatprep.mubr.msk.f32.mxu1 %vm254_vm0, %v251_v6  ;;  %v387_v24 = vld [vmem:[%s695_s26 + $0x18] sm:$0xff]  ;;  %v386_v30 = vld [vmem:[%s695_s26 + $0x10] sm:$0xff]  ;;  %v445_v55 = vld [vmem:[%s709_s29 + $0x28] sm:$0xff] }
  0x13   : > { %v390_v41 = vld [vmem:[%s695_s26 + $0x30] sm:$0xff]  ;;  %v391_v42 = vld [vmem:[%s695_s26 + $0x38] sm:$0xff]  ;;  %v441_v58 = vld [vmem:[%s709_s29 + $0x8] sm:$0xff] }
  0x14   : > { %599 = vmatmul.mubr.msk.f32.gmra.mxu0 %vm254_vm0, %v248_v7  ;;  %v443_v63 = vld [vmem:[%s709_s29 + $0x18] sm:$0xff]  ;;  %v440_v1 = vld [vmem:[%s709_s29] sm:$0xff]  ;;  %v442_v7 = vld [vmem:[%s709_s29 + $0x10] sm:$0xff] }
  0x15   : > { %605 = vmatmul.mubr.msk.f32.gmra.mxu1 %vm254_vm0, %v252_v8 }
  0xd0   : > { %v597_v9 = vpop.f32.mrf.mxu0 }
  0xd1   : > { %v603_v10 = vpop.f32.mrf.mxu1  ;;  %v393_v13 = vmul.f32 0.5, %v597_v9  ;;  %v444_v9 = vld [vmem:[%s709_s29 + $0x20] sm:$0xff] }
  0xd2   : > { %v397_v14 = vmul.f32 0.5, %v603_v10  ;;  %v345_v15 = vpop.f32.mrf.mxu0 }
  0xd3   : > { %v365_v16 = vpop.f32.mrf.mxu1  ;;  %v392_v17 = vmul.f32 0.5, %v345_v15  ;;  %v401_v19 = vadd.f32 %v393_v13, %v385_v12  ;;  %v447_v15 = vld [vmem:[%s709_s29 + $0x38] sm:$0xff] }
  0xd4   : > { %v405_v18 = vadd.f32 %v397_v14, %v389_v11  ;;  %v396_v21 = vmul.f32 0.5, %v365_v16  ;;  %v600_v22 = vpop.f32.mrf.mxu0 }
  0xd5   : > { %v606_v23 = vpop.f32.mrf.mxu1  ;;  %v395_v25 = vmul.f32 0.5, %v600_v22  ;;  %v409_v27 = vmul.f32 %v401_v19, %v401_v19  ;;  %v400_v32 = vadd.f32 %v392_v17, %v384_v20  ;;  %v446_v17 = vld [vmem:[%s709_s29 + $0x30] sm:$0xff] }
  0xd6   : > { %v413_v26 = vmul.f32 %v405_v18, %v405_v18  ;;  %v355_v29 = vpop.f32.mrf.mxu0  ;;  %v399_v35 = vmul.f32 0.5, %v606_v23  ;;  %v404_v36 = vadd.f32 %v396_v21, %v388_v28 }
  0xd7   : > { %v375_v31 = vpop.f32.mrf.mxu1  ;;  %v394_v33 = vmul.f32 0.5, %v355_v29  ;;  %418 = vadd.xlane.f32.xlu0 %v409_v27  ;;  %v403_v34 = vadd.f32 %v395_v25, %v387_v24  ;;  %v408_v40 = vmul.f32 %v400_v32, %v400_v32 }
  0xd8   : > { %426 = vadd.xlane.f32.xlu1 %v413_v26  ;;  %v398_v38 = vmul.f32 0.5, %v375_v31  ;;  %v412_v45 = vmul.f32 %v404_v36, %v404_v36  ;;  %v407_v46 = vadd.f32 %v399_v35, %v391_v42 }
  0xd9   : > { %v402_v37 = vadd.f32 %v394_v33, %v386_v30  ;;  %v411_v39 = vmul.f32 %v403_v34, %v403_v34 }
  0xda   : > { %v406_v43 = vadd.f32 %v398_v38, %v390_v41  ;;  %v415_v47 = vmul.f32 %v407_v46, %v407_v46 }
  0xdb   : > { %416 = vadd.xlane.f32.xlu0 %v408_v40  ;;  %v410_v44 = vmul.f32 %v402_v37, %v402_v37 }
  0xdc   : > { %422 = vadd.xlane.f32.xlu1 %v411_v39  ;;  %v414_v48 = vmul.f32 %v406_v43, %v406_v43 }
  0xdf   : > { %424 = vadd.xlane.f32.xlu0 %v412_v45 }
  0xe0   : > { %420 = vadd.xlane.f32.xlu1 %v410_v44 }
  0xe3   : > { %428 = vadd.xlane.f32.xlu0 %v414_v48 }
  0xe4   : > { %430 = vadd.xlane.f32.xlu1 %v415_v47 }
 0x160   : > { %v419_v50 = vpop.xlane.xlu0 %418 }
 0x161   : > { %v427_v49 = vpop.xlane.xlu1 %426  ;;  %vm433_vm3 = vcmp.gt.f32.partialorder %v419_v50, 0.0 }
 0x162   : > { %617 = vrsqrt.f32 %v427_v49  ;;  %vm437_vm2 = vcmp.gt.f32.partialorder %v427_v49, 0.0 }
 0x163   : > { %619 = vrsqrt.f32 %v419_v50 }
 0x164   : > { %v417_v52 = vpop.xlane.xlu0 %416 }
 0x165   : > { %v423_v51 = vpop.xlane.xlu1 %422  ;;  %vm432_vm5 = vcmp.gt.f32.partialorder %v417_v52, 0.0 }
 0x166   : > { %621 = vrsqrt.f32 %v423_v51  ;;  %vm435_vm4 = vcmp.gt.f32.partialorder %v423_v51, 0.0 }
 0x167   : > { %623 = vrsqrt.f32 %v417_v52 }
 0x168   : > { %v425_v54 = vpop.xlane.xlu0 %424 }
 0x169   : > { %v421_v53 = vpop.xlane.xlu1 %420  ;;  %vm436_vm7 = vcmp.gt.f32.partialorder %v425_v54, 0.0 }
 0x16a   : > { %625 = vrsqrt.f32 %v421_v53  ;;  %vm434_vm6 = vcmp.gt.f32.partialorder %v421_v53, 0.0 }
 0x16b   : > { %627 = vrsqrt.f32 %v425_v54 }
 0x16c   : > { %v429_v57 = vpop.xlane.xlu0 %428 }
 0x16d   : > { %v431_v56 = vpop.xlane.xlu1 %430  ;;  %vm438_vm9 = vcmp.gt.f32.partialorder %v429_v57, 0.0 }
 0x16e   : > { %629 = vrsqrt.f32 %v431_v56  ;;  %vm439_vm8 = vcmp.gt.f32.partialorder %v431_v56, 0.0 }
 0x16f   : > { %v618_v59 = vpop.eup %617  ;;  %631 = vrsqrt.f32 %v429_v57 }
 0x170   : > { %v620_v60 = vpop.eup %619  ;;  %v461_v61 = vmul.f32 %v618_v59, %v445_v55 }
 0x171   : > { %v457_v62 = vmul.f32 %v620_v60, %v441_v58 }
 0x172   : > { %v469_v0 = vsel %vm437_vm2, %v461_v61, 0.0 }
 0x173   : > { %v622_v2 = vpop.eup %621  ;;  %478 = vst.msk [vmem:[%s717_s6 + $0x28] sm:$0xff] %vm472_vm1, %v469_v0  ;;  %v465_v3 = vsel %vm433_vm3, %v457_v62, 0.0 }
 0x174   : > { %v624_v4 = vpop.eup %623  ;;  %474 = vst.msk [vmem:[%s717_s6 + $0x8] sm:$0xff] %vm472_vm1, %v465_v3  ;;  %v459_v5 = vmul.f32 %v622_v2, %v443_v63 }
 0x175   : > { %v456_v6 = vmul.f32 %v624_v4, %v440_v1 }
 0x176   : > { %v467_v8 = vsel %vm435_vm4, %v459_v5, 0.0 }
 0x177   : > { %v626_v10 = vpop.eup %625  ;;  %476 = vst.msk [vmem:[%s717_s6 + $0x18] sm:$0xff] %vm472_vm1, %v467_v8  ;;  %v464_v11 = vsel %vm432_vm5, %v456_v6, 0.0 }
 0x178   : > { %v628_v12 = vpop.eup %627  ;;  %473 = vst.msk [vmem:[%s717_s6] sm:$0xff] %vm472_vm1, %v464_v11  ;;  %v458_v13 = vmul.f32 %v626_v10, %v442_v7 }
 0x179   : > { %v460_v14 = vmul.f32 %v628_v12, %v444_v9 }
 0x17a   : > { %v466_v16 = vsel %vm434_vm6, %v458_v13, 0.0 }
 0x17b   : > { %v630_v18 = vpop.eup %629  ;;  %475 = vst.msk [vmem:[%s717_s6 + $0x10] sm:$0xff] %vm472_vm1, %v466_v16  ;;  %v468_v19 = vsel %vm436_vm7, %v460_v14, 0.0 }
 0x17c   : > { %v632_v20 = vpop.eup %631  ;;  %477 = vst.msk [vmem:[%s717_s6 + $0x20] sm:$0xff] %vm472_vm1, %v468_v19  ;;  %v463_v21 = vmul.f32 %v630_v18, %v447_v15 }
 0x17d   : > { %v462_v22 = vmul.f32 %v632_v20, %v446_v17 }
 0x17e   : > { %v471_v23 = vsel %vm439_vm8, %v463_v21, 0.0 }
 0x17f   : > { %480 = vst.msk [vmem:[%s717_s6 + $0x38] sm:$0xff] %vm472_vm1, %v471_v23  ;;  %v470_v24 = vsel %vm438_vm9, %v462_v22, 0.0 }
 0x180   : > { %479 = vst.msk [vmem:[%s717_s6 + $0x30] sm:$0xff] %vm472_vm1, %v470_v24 }
 0x181 PF: > { %s14_s15 = sadd.s32 1, %s639_s15  }
 0x182   : > { %p11_p4 = scmp.ge.s32.totalorder %s14_s15, 4  }
 0x184   :  { %13 = sbr.rel (!%p11_p4) target bundleno = 1 (0x1), region = 72 }

</bundles_post_ra>
